<compile_context>
chip_gen: v5e
topology: v5e:2x2
jax: 0.10.0
libtpu: 0.0.40
codegen_flags: <defaults>
</compile_context>

<pallas_src>
import functools
import math

import jax
import jax.numpy as jnp
from jax.experimental import pallas as pl
from jax.experimental.pallas import tpu as pltpu

LANE = 128


def _round_up(n, m):
    return ((n + m - 1) // m) * m


def _pad2d(a, shape):
    pr, pc = shape[0] - a.shape[0], shape[1] - a.shape[1]
    if pr == 0 and pc == 0:
        return a
    return jnp.pad(a, ((0, pr), (0, pc)))


def _row_tile(n_pad):
    # 256-row adj tiles when they divide evenly (v6e/v7x sweet spot), else 128.
    # TODO(synk): prefer 128 on v5e (16 MiB default scoped VMEM, 4x128^2 MXU);
    # select per-generation via pltpu.get_tpu_info().
    return 256 if n_pad % 256 == 0 else 128


def _vmem_limit_bytes(entries, margin=2 << 20, floor=32 << 20, cap=64 << 20):
    """Sum (shape, itemsize, n_buffers) footprints; clamp to a safe window.

    cap = 64 MiB keeps us inside v7x physical VMEM.
    TODO(synk): raise the cap toward ~100 MiB on v5e/v6e for very large graphs.
    """
    total = sum(math.prod(shape) * itemsize * bufs
                for shape, itemsize, bufs in entries)
    return int(min(max(total + margin, floor), cap))


# ----------------------------------------------------------------------------
# Kernels
# ----------------------------------------------------------------------------
def _support_kernel(x_ref, wT_ref, b_ref, o_ref):
    """s = x_tile @ W^T + b   (bf16 MXU inputs, f32 accumulate, bf16 store)."""
    s = jnp.dot(x_ref[...], wT_ref[...], preferred_element_type=jnp.float32)
    s = s + b_ref[...]
    o_ref[...] = s.astype(o_ref.dtype)


def _agg_support_kernel(seed_ref, adj_ref, s1_ref, w2T_ref, b2_ref, o_ref, *,
                        apply_relu, dropout_p, training):
    """s2_tile = dropout(relu(adj_tile @ s1)) @ W2^T + b2."""
    h = jnp.dot(adj_ref[...], s1_ref[...], preferred_element_type=jnp.float32)
    if apply_relu:
        h = jnp.maximum(h, 0.0)

    # Dropout (training only; Python-level guard => not traced in eval mode).
    if training and dropout_p > 0.0:
        # TODO(synk): TPU hardware PRNG cannot bit-match torch's dropout mask.
        pltpu.prng_seed(seed_ref[0] + pl.program_id(0))  # distinct per tile
        bits = pltpu.bitcast(pltpu.prng_random_bits(h.shape), jnp.uint32)
        thresh = min(int(round(dropout_p * (2.0 ** 32))), 2 ** 32 - 1)
        keep = bits >= jnp.uint32(thresh)
        h = jnp.where(keep, h * jnp.float32(1.0 / (1.0 - dropout_p)),
                      jnp.float32(0.0))

    s2 = jnp.dot(h.astype(w2T_ref.dtype), w2T_ref[...],
                 preferred_element_type=jnp.float32)
    s2 = s2 + b2_ref[...]
    o_ref[...] = s2.astype(o_ref.dtype)


def _agg_kernel(adj_ref, s_ref, o_ref):
    """y_tile = adj_tile @ s."""
    y = jnp.dot(adj_ref[...], s_ref[...], preferred_element_type=jnp.float32)
    o_ref[...] = y.astype(o_ref.dtype)


# ----------------------------------------------------------------------------
# pallas_call wrappers
# ----------------------------------------------------------------------------
def _support(x_p, wT_p, b_p, *, tm):
    n_pad, f_in = x_p.shape
    f_out = wT_p.shape[1]
    grid = (n_pad // tm,)
    cost = pl.CostEstimate(
        flops=2 * n_pad * f_in * f_out,
        bytes_accessed=2 * (n_pad * f_in + f_in * f_out + n_pad * f_out)
        + 4 * f_out,
        transcendentals=0)
    vmem = _vmem_limit_bytes([
        ((tm, f_in), 2, 2), ((f_in, f_out), 2, 2), ((1, f_out), 4, 2),
        ((tm, f_out), 2, 2), ((tm, f_out), 4, 1)])
    return pl.pallas_call(
        _support_kernel,
        out_shape=jax.ShapeDtypeStruct((n_pad, f_out), jnp.bfloat16),
        grid=grid,
        in_specs=[
            pl.BlockSpec((tm, f_in), lambda i: (i, 0)),      # x row tile
            pl.BlockSpec((f_in, f_out), lambda i: (0, 0)),   # W^T resident
            pl.BlockSpec((1, f_out), lambda i: (0, 0)),      # bias resident
        ],
        out_specs=pl.BlockSpec((tm, f_out), lambda i: (i, 0)),
        compiler_params=pltpu.CompilerParams(
            dimension_semantics=("parallel",), vmem_limit_bytes=vmem),
        cost_estimate=cost,
    )(x_p, wT_p, b_p)


def _agg_support(seed_arr, adj_p, s1, w2T_p, b2_p, *, tm, apply_relu,
                 dropout_p, training):
    n_pad = adj_p.shape[0]
    f_hid = s1.shape[1]
    f_cls = w2T_p.shape[1]
    grid = (n_pad // tm,)
    kernel = functools.partial(_agg_support_kernel, apply_relu=apply_relu,
                               dropout_p=dropout_p, training=training)
    cost = pl.CostEstimate(
        flops=2 * n_pad * (n_pad * f_hid + f_hid * f_cls),
        bytes_accessed=2 * (n_pad * n_pad + n_pad * f_hid + f_hid * f_cls
                            + n_pad * f_cls) + 4 * f_cls,
        transcendentals=0)
    vmem = _vmem_limit_bytes([
        ((tm, n_pad), 2, 2),       # streamed adj row tile (double-buffered)
        ((n_pad, f_hid), 2, 2),    # s1 resident
        ((f_hid, f_cls), 2, 2),    # W2^T resident
        ((1, f_cls), 4, 2),        # b2 resident
        ((tm, f_cls), 2, 2),       # output tile
        ((tm, f_hid), 4, 2),       # f32 h intermediate headroom
    ])
    gs = pltpu.PrefetchScalarGridSpec(
        num_scalar_prefetch=1,     # dropout seed lives in SMEM
        grid=grid,
        in_specs=[
            pl.BlockSpec((tm, n_pad), lambda i, seed: (i, 0)),
            pl.BlockSpec((n_pad, f_hid), lambda i, seed: (0, 0)),
            pl.BlockSpec((f_hid, f_cls), lambda i, seed: (0, 0)),
            pl.BlockSpec((1, f_cls), lambda i, seed: (0, 0)),
        ],
        out_specs=pl.BlockSpec((tm, f_cls), lambda i, seed: (i, 0)),
    )
    return pl.pallas_call(
        kernel,
        out_shape=jax.ShapeDtypeStruct((n_pad, f_cls), jnp.bfloat16),
        grid_spec=gs,
        compiler_params=pltpu.CompilerParams(
            dimension_semantics=("parallel",), vmem_limit_bytes=vmem),
        cost_estimate=cost,
    )(seed_arr, adj_p, s1, w2T_p, b2_p)


def _aggregate(adj_p, s_p, *, tm, out_dtype):
    n_pad = adj_p.shape[0]
    f_out = s_p.shape[1]
    grid = (n_pad // tm,)
    out_itemsize = jnp.dtype(out_dtype).itemsize
    cost = pl.CostEstimate(
        flops=2 * n_pad * n_pad * f_out,
        bytes_accessed=2 * (n_pad * n_pad + n_pad * f_out)
        + out_itemsize * n_pad * f_out,
        transcendentals=0)
    vmem = _vmem_limit_bytes([
        ((tm, n_pad), 2, 2), ((n_pad, f_out), 2, 2),
        ((tm, f_out), out_itemsize, 2)])
    return pl.pallas_call(
        _agg_kernel,
        out_shape=jax.ShapeDtypeStruct((n_pad, f_out), out_dtype),
        grid=grid,
        in_specs=[
            pl.BlockSpec((tm, n_pad), lambda i: (i, 0)),     # adj row tile
            pl.BlockSpec((n_pad, f_out), lambda i: (0, 0)),  # support resident
        ],
        out_specs=pl.BlockSpec((tm, f_out), lambda i: (i, 0)),
        compiler_params=pltpu.CompilerParams(
            dimension_semantics=("parallel",), vmem_limit_bytes=vmem),
        cost_estimate=cost,
    )(adj_p, s_p)


# ----------------------------------------------------------------------------
# Host-side GCN
# ----------------------------------------------------------------------------
def prepare_gcn(adj, params):
    """Pad + bf16-cast adjacency and weights ONCE (hoisted off per-call path)."""
    w1T, b1, w2T, b2 = params
    nfeat, nhid = w1T.shape
    nclass = w2T.shape[1]
    n = adj.shape[0]

    n_pad = _round_up(n, LANE)
    f_in = _round_up(nfeat, LANE)
    f_hid = _round_up(nhid, LANE)
    f_cls = _round_up(nclass, LANE)

    adj_p = _pad2d(adj, (n_pad, n_pad)).astype(jnp.bfloat16)
    w1T_p = _pad2d(w1T, (f_in, f_hid)).astype(jnp.bfloat16)
    b1_p = _pad2d(b1.reshape(1, -1).astype(jnp.float32), (1, f_hid))
    w2T_p = _pad2d(w2T, (f_hid, f_cls)).astype(jnp.bfloat16)
    b2_p = _pad2d(b2.reshape(1, -1).astype(jnp.float32), (1, f_cls))

    meta = dict(n=n, n_pad=n_pad, f_in=f_in, f_hid=f_hid, f_cls=f_cls,
                nclass=nclass)
    return (adj_p, w1T_p, b1_p, w2T_p, b2_p), meta


def gcn_forward(x, prepared, meta, *, dropout_p, use_relu=True,
                training=False, seed=0):
    """y = adj @ (dropout(relu(adj @ (x W1^T + b1))) W2^T + b2)."""
    adj_p, w1T_p, b1_p, w2T_p, b2_p = prepared
    n, nclass = meta["n"], meta["nclass"]
    n_pad, f_in = meta["n_pad"], meta["f_in"]

    tm = _row_tile(n_pad)
    x_p = _pad2d(x, (n_pad, f_in)).astype(jnp.bfloat16)
    seed_arr = jnp.array([seed], dtype=jnp.int32)

    s1 = _support(x_p, w1T_p, b1_p, tm=tm)                        # (n_pad, f_hid)
    s2 = _agg_support(seed_arr, adj_p, s1, w2T_p, b2_p, tm=tm,
                      apply_relu=bool(use_relu),
                      dropout_p=float(dropout_p),
                      training=bool(training))                    # (n_pad, f_cls)
    y_p = _aggregate(adj_p, s2, tm=tm, out_dtype=x.dtype)         # (n_pad, f_cls)
    return y_p[:n, :nclass]


def init_gcn_params(key, nfeat, nhid, nclass, dtype=jnp.float32):
    """Deterministic init mirroring the PyTorch module.

    nn.Linear weight shape [out, in]; GraphConvolution.init() sets weights to
    uniform(-1/sqrt(in), 1/sqrt(in)); bias keeps default Linear init which is
    also uniform(-1/sqrt(in), 1/sqrt(in)).
    """
    k1, k2, k3, k4 = jax.random.split(key, 4)
    s1 = 1.0 / math.sqrt(nfeat)
    s2 = 1.0 / math.sqrt(nhid)
    w1 = jax.random.uniform(k1, (nhid, nfeat), dtype, -s1, s1)
    b1 = jax.random.uniform(k2, (nhid,), dtype, -s1, s1)
    w2 = jax.random.uniform(k3, (nclass, nhid), dtype, -s2, s2)
    b2 = jax.random.uniform(k4, (nclass,), dtype, -s2, s2)
    # Pre-transpose weights so the kernels compute x @ W^T as a plain matmul.
    return (w1.T, b1, w2.T, b2)


if __name__ == "__main__":
    # Small synthetic graph: 16 nodes, 32 input features, 32 hidden, 8 classes.
    N, NFEAT, NHID, NCLASS = 16, 32, 32, 8
    DROPOUT = 0.5

    key = jax.random.PRNGKey(0)
    kx, ka, kp = jax.random.split(key, 3)

    x = jax.random.normal(kx, (N, NFEAT), jnp.float32)
    # Symmetric normalized-ish dense adjacency (values in [0,1], self loops).
    a_raw = jax.random.uniform(ka, (N, N), jnp.float32)
    adj = (a_raw + a_raw.T) * 0.5 + jnp.eye(N, dtype=jnp.float32)
    adj = adj / jnp.sum(adj, axis=1, keepdims=True)

    params = init_gcn_params(kp, NFEAT, NHID, NCLASS)
    prepared, meta = prepare_gcn(adj, params)

    out = gcn_forward(x, prepared, meta, dropout_p=DROPOUT,
                      use_relu=True, training=False)
    jax.block_until_ready(out)

    # Pure-JAX f32 reference (eval mode).  Kernel matmul inputs are bf16, so
    # the tolerance is loosened vs. the old f32-only kernel.
    w1T, b1, w2T, b2 = params
    ref = adj @ (jnp.maximum(adj @ (x @ w1T + b1), 0.0) @ w2T + b2)
    assert out.shape == (N, NCLASS)
    assert jnp.allclose(out, ref, atol=5e-2, rtol=5e-2), (
        float(jnp.max(jnp.abs(out - ref))))

    print("KERNEL_OK")
</pallas_src>

<mosaic_0001>
module attributes {stable_mosaic.version = 11 : i64} {
  func.func @_support_kernel(%arg0: i32, %arg1: memref<128x128xbf16, #tpu.memory_space<vmem>>, %arg2: memref<128x128xbf16, #tpu.memory_space<vmem>>, %arg3: memref<1x128xf32, #tpu.memory_space<vmem>>, %arg4: memref<128x128xbf16, #tpu.memory_space<vmem>>) attributes {dimension_semantics = [#tpu.dimension_semantics<parallel>], iteration_bounds = array<i64: 1>, scalar_prefetch = 0 : i64, scratch_operands = 0 : i64, tpu.core_type = #tpu.core_type<tc>, window_params = [{transform_indices = @transform_0, window_bounds = array<i64: 128, 128>}, {pipeline_mode = #tpu.pipeline_mode<synchronous>, transform_indices = @transform_1, window_bounds = array<i64: 128, 128>}, {pipeline_mode = #tpu.pipeline_mode<synchronous>, transform_indices = @transform_2, window_bounds = array<i64: 1, 128>}, {transform_indices = @transform_3, window_bounds = array<i64: 128, 128>}]} {
    %c0 = arith.constant 0 : index
    %c0_0 = arith.constant 0 : index
    %0 = vector.load %arg1[%c0, %c0_0] : memref<128x128xbf16, #tpu.memory_space<vmem>>, vector<128x128xbf16>
    %c0_1 = arith.constant 0 : index
    %c0_2 = arith.constant 0 : index
    %1 = vector.load %arg2[%c0_1, %c0_2] : memref<128x128xbf16, #tpu.memory_space<vmem>>, vector<128x128xbf16>
    %cst = arith.constant dense<0.000000e+00> : vector<128x128xf32>
    %2 = tpu.matmul %0, %1, %cst {dimension_numbers = #tpu.dot_dimension_numbers<[1], [0], [0], [1], [0, 0, 1, 1], [], []>} : vector<128x128xbf16>, vector<128x128xbf16>, vector<128x128xf32> -> vector<128x128xf32>
    %c0_3 = arith.constant 0 : index
    %c0_4 = arith.constant 0 : index
    %3 = vector.load %arg3[%c0_3, %c0_4] : memref<1x128xf32, #tpu.memory_space<vmem>>, vector<1x128xf32>
    %4 = vector.broadcast %3 : vector<1x128xf32> to vector<128x128xf32>
    %5 = arith.addf %2, %4 : vector<128x128xf32>
    %6 = arith.truncf %5 : vector<128x128xf32> to vector<128x128xbf16>
    %c0_5 = arith.constant 0 : index
    %c0_6 = arith.constant 0 : index
    %7 = vector.load %arg4[%c0_5, %c0_6] : memref<128x128xbf16, #tpu.memory_space<vmem>>, vector<128x128xbf16>
    tpu.vector_store %arg4[%c0_5, %c0_6], %6 {strides = array<i32>} : memref<128x128xbf16, #tpu.memory_space<vmem>>, vector<128x128xbf16>,
    return
  }
  func.func @transform_0(%arg0: i32) -> (i32, i32) {
    %c0_i32 = arith.constant 0 : i32
    %c0_i32_0 = arith.constant 0 : i32
    return %arg0, %c0_i32 : i32, i32
  }
  func.func @transform_1(%arg0: i32) -> (i32, i32) {
    %c0_i32 = arith.constant 0 : i32
    %c0_i32_0 = arith.constant 0 : i32
    %c0_i32_1 = arith.constant 0 : i32
    return %c0_i32, %c0_i32_0 : i32, i32
  }
  func.func @transform_2(%arg0: i32) -> (i32, i32) {
    %c0_i32 = arith.constant 0 : i32
    %c0_i32_0 = arith.constant 0 : i32
    %c0_i32_1 = arith.constant 0 : i32
    return %c0_i32, %c0_i32_0 : i32, i32
  }
  func.func @transform_3(%arg0: i32) -> (i32, i32) {
    %c0_i32 = arith.constant 0 : i32
    %c0_i32_0 = arith.constant 0 : i32
    return %arg0, %c0_i32 : i32, i32
  }
}

</mosaic_0001>

<bundles_post_ra>
// kernel: tpu_custom_call.1
= control target key start
LH: loop header
LB: loop body
LE: loop exit
PB: predicated region body
PF: predicated region fallthrough
CT: control target
= control target key end

     0   :  { %8 = vsyncpa [#allocation3], 0  ;;  %s561_s0 = inlined_call_operand.hbm [shape: bf16[128,128], index: 0, kind: input, shape index: {}]   ;;  %s562_s1 = inlined_call_operand.hbm [shape: bf16[128,128], index: 1, kind: input, shape index: {}]   ;;  %s563_s2 = inlined_call_operand.vmem [shape: f32[1,128], index: 2, kind: input, shape index: {}]   ;;  %s564_s3 = inlined_call_operand.hbm [shape: bf16[128,128], index: 3, kind: output, shape index: {}]  }
   0x1   :  { %9 = vsyncpa [#allocation6], 0 }
   0x2   :  { %10 = vsyncpa [#allocation4], 0  ;;  %s15_s14 = sshll.u32 %s561_s0, 4  ;;  %s515_s15 = smov [#allocation2]   ;;  %s16_s14 = int_to_ptr.hbm [resolvable:$true] %s15_s14 }
   0x3   :  { %s17_s16 = sshll.u32 %s515_s15, 4  ;;  %s28_s19 = sshll.u32 %s562_s1, 4  ;;  %s18_s16 = int_to_ptr.vmem [resolvable:$true] %s17_s16  ;;  %s29_s19 = int_to_ptr.hbm [resolvable:$true] %s28_s19 }
   0x4   :  { %s516_s20 = smov 64   ;;  %s517_s21 = smov 4  }
   0x5   :  { %23 = dma.hbm_to_vmem [thread:$0]  %s16_s14, 1024, %s18_s16, [#allocation3], %s516_s20, %s516_s20, %s517_s21  }
   0x6   :  { %s518_s22 = smov [#allocation5]  }
   0x7   :  { %s30_s23 = sshll.u32 %s518_s22, 4  ;;  %s31_s23 = int_to_ptr.vmem [resolvable:$true] %s30_s23 }
   0x8   :  { %36 = dma.hbm_to_vmem [thread:$0]  %s29_s19, 1024, %s31_s23, [#allocation6], %s516_s20, %s516_s20, %s517_s21  }
   0x9   :  { %509 = dma.done.wait [#allocation3], 1024  }
   0xa   :  { %510 = vsyncadd [#allocation3], 4294966272 }
   0xb   :  { %511 = dma.done.wait [#allocation6], 1024  }
   0xc   :  { %512 = vsyncadd [#allocation6], 4294966272  ;;  %v359_v0 = vld [vmem:[#allocation5 + $0x38] sm:$0xff]  ;;  %v358_v1 = vld [vmem:[#allocation5 + $0x30] sm:$0xff]  ;;  %s266_s27 = sshll.u32 %s564_s3, 4  ;;  %s267_s27 = int_to_ptr.hbm [resolvable:$true] %s266_s27 }
   0xd   :  { %179 = vmatpush.bf16.msra.mxu0 %v359_v0  ;;  %407 = vmatpush.bf16.msra.mxu1 %v359_v0  ;;  %v357_v2 = vld [vmem:[#allocation5 + $0x28] sm:$0xff]  ;;  %v356_v3 = vld [vmem:[#allocation5 + $0x20] sm:$0xff]  ;;  %v355_v4 = vld [vmem:[#allocation5 + $0x18] sm:$0xff] }
   0xe   :  { %408 = vmatpush.bf16.msra.mxu2 %v359_v0  ;;  %409 = vmatpush.bf16.msra.mxu3 %v359_v0  ;;  %v354_v5 = vld [vmem:[#allocation5 + $0x10] sm:$0xff]  ;;  %v353_v6 = vld [vmem:[#allocation5 + $0x8] sm:$0xff]  ;;  %v352_v7 = vld [vmem:[#allocation5] sm:$0xff] }
   0xf   :  { %v344_v8 = vld [vmem:[#allocation2] sm:$0xff]  ;;  %v346_v9 = vld [vmem:[#allocation2 + $0x10] sm:$0xff]  ;;  %v345_v12 = vld [vmem:[#allocation2 + $0x8] sm:$0xff] }
  0x10   :  { %v348_v10 = vld [vmem:[#allocation2 + $0x20] sm:$0xff]  ;;  %v350_v11 = vld [vmem:[#allocation2 + $0x30] sm:$0xff]  ;;  %v347_v13 = vld [vmem:[#allocation2 + $0x18] sm:$0xff] }
  0x11   :  { %180 = vmatpush.bf16.msra.mxu0 %v358_v1  ;;  %410 = vmatpush.bf16.msra.mxu1 %v358_v1  ;;  %v349_v14 = vld [vmem:[#allocation2 + $0x28] sm:$0xff]  ;;  %v351_v15 = vld [vmem:[#allocation2 + $0x38] sm:$0xff]  ;;  %v436_v18 = vld [vmem:[%s563_s2] ss:$0 sm:$0xff]  ;;  %s519_s2 = smov [#allocation7]  }
  0x12   :  { %411 = vmatpush.bf16.msra.mxu2 %v358_v1  ;;  %412 = vmatpush.bf16.msra.mxu3 %v358_v1  ;;  %s264_s24 = sshll.u32 %s519_s2, 4  ;;  %s265_s24 = int_to_ptr.vmem [resolvable:$true] %s264_s24 }
  0x15   :  { %181 = vmatpush.bf16.msra.mxu0 %v357_v2  ;;  %413 = vmatpush.bf16.msra.mxu1 %v357_v2 }
  0x16   :  { %414 = vmatpush.bf16.msra.mxu2 %v357_v2  ;;  %415 = vmatpush.bf16.msra.mxu3 %v357_v2 }
  0x19   :  { %182 = vmatpush.bf16.msra.mxu0 %v356_v3  ;;  %416 = vmatpush.bf16.msra.mxu1 %v356_v3 }
  0x1a   :  { %417 = vmatpush.bf16.msra.mxu2 %v356_v3  ;;  %418 = vmatpush.bf16.msra.mxu3 %v356_v3 }
  0x1d   :  { %183 = vmatpush.bf16.msra.mxu0 %v355_v4  ;;  %419 = vmatpush.bf16.msra.mxu1 %v355_v4 }
  0x1e   :  { %420 = vmatpush.bf16.msra.mxu2 %v355_v4  ;;  %421 = vmatpush.bf16.msra.mxu3 %v355_v4 }
  0x21   :  { %184 = vmatpush.bf16.msra.mxu0 %v354_v5  ;;  %422 = vmatpush.bf16.msra.mxu1 %v354_v5 }
  0x22   :  { %423 = vmatpush.bf16.msra.mxu2 %v354_v5  ;;  %424 = vmatpush.bf16.msra.mxu3 %v354_v5 }
  0x25   :  { %185 = vmatpush.bf16.msra.mxu0 %v353_v6  ;;  %425 = vmatpush.bf16.msra.mxu1 %v353_v6 }
  0x26   :  { %426 = vmatpush.bf16.msra.mxu2 %v353_v6  ;;  %427 = vmatpush.bf16.msra.mxu3 %v353_v6 }
  0x29   :  { %186 = vmatpush.bf16.msra.mxu0 %v352_v7  ;;  %428 = vmatpush.bf16.msra.mxu1 %v352_v7 }
  0x2a   :  { %429 = vmatpush.bf16.msra.mxu2 %v352_v7  ;;  %430 = vmatpush.bf16.msra.mxu3 %v352_v7 }
  0x2c   :  { %187 = vmatmul.bf16.vlgmr.msra.gmra.mxu0 %v344_v8  ;;  %197 = vmatmul.bf16.vlgmr.msra.gmra.mxu1 %v346_v9 }
  0x2d   :  { %207 = vmatmul.bf16.vlgmr.msra.gmra.mxu2 %v348_v10  ;;  %217 = vmatmul.bf16.vlgmr.msra.gmra.mxu3 %v350_v11 }
  0x3c   :  { %192 = vmatmul.bf16.gmra.mxu0 %v345_v12  ;;  %202 = vmatmul.bf16.gmra.mxu1 %v347_v13 }
  0x3d   :  { %212 = vmatmul.bf16.gmra.mxu2 %v349_v14  ;;  %222 = vmatmul.bf16.gmra.mxu3 %v351_v15 }
  0xa9   :  { %v188_v16 = vpop.f32.mrf.mxu0  ;;  %v198_v17 = vpop.f32.mrf.mxu1 }
  0xaa   :  { %v189_v23 = vadd.f32 %v436_v18, %v188_v16  ;;  %v199_v24 = vadd.f32 %v436_v18, %v198_v17 }
  0xb0   :  { %v208_v19 = vpop.f32.mrf.mxu2  ;;  %v218_v20 = vpop.f32.mrf.mxu3 }
  0xb1   :  { %v190_v21 = vpop.f32.mrf.mxu0  ;;  %v200_v22 = vpop.f32.mrf.mxu1  ;;  %v209_v31 = vadd.f32 %v436_v18, %v208_v19  ;;  %v219_v32 = vadd.f32 %v436_v18, %v218_v20 }
  0xb2   :  { %v191_v25 = vadd.f32 %v436_v18, %v190_v21  ;;  %v201_v26 = vadd.f32 %v436_v18, %v200_v22 }
  0xb4   :  { %v363_v27 = vpack.c.bf16 %v191_v25, %v189_v23  ;;  %v373_v28 = vpack.c.bf16 %v201_v26, %v199_v24 }
  0xb6   :  { %364 = vst [vmem:[#allocation7] sm:$0xff] %v363_v27  }
  0xb7   :  { %401 = vst [vmem:[#allocation7 + $0x10] sm:$0xff] %v373_v28  }
  0xb8   :  { %v210_v29 = vpop.f32.mrf.mxu2  ;;  %v220_v30 = vpop.f32.mrf.mxu3 }
  0xb9   :  { %v211_v33 = vadd.f32 %v436_v18, %v210_v29  ;;  %v221_v34 = vadd.f32 %v436_v18, %v220_v30  ;;  %v193_v35 = vpop.f32.mrf.mxu0  ;;  %v203_v36 = vpop.f32.mrf.mxu1 }
  0xba   :  { %v194_v43 = vadd.f32 %v436_v18, %v193_v35  ;;  %v204_v44 = vadd.f32 %v436_v18, %v203_v36 }
  0xbb   :  { %v383_v37 = vpack.c.bf16 %v211_v33, %v209_v31  ;;  %v393_v38 = vpack.c.bf16 %v221_v34, %v219_v32 }
  0xbd   :  { %403 = vst [vmem:[#allocation7 + $0x20] sm:$0xff] %v383_v37  }
  0xbe   :  { %405 = vst [vmem:[#allocation7 + $0x30] sm:$0xff] %v393_v38  }
  0xc0   :  { %v213_v39 = vpop.f32.mrf.mxu2  ;;  %v223_v40 = vpop.f32.mrf.mxu3 }
  0xc1   :  { %v195_v41 = vpop.f32.mrf.mxu0  ;;  %v205_v42 = vpop.f32.mrf.mxu1  ;;  %v214_v51 = vadd.f32 %v436_v18, %v213_v39  ;;  %v224_v52 = vadd.f32 %v436_v18, %v223_v40 }
  0xc2   :  { %v196_v45 = vadd.f32 %v436_v18, %v195_v41  ;;  %v206_v46 = vadd.f32 %v436_v18, %v205_v42 }
  0xc4   :  { %v368_v47 = vpack.c.bf16 %v196_v45, %v194_v43  ;;  %v378_v48 = vpack.c.bf16 %v206_v46, %v204_v44 }
  0xc6   :  { %400 = vst [vmem:[#allocation7 + $0x8] sm:$0xff] %v368_v47  }
  0xc7   :  { %402 = vst [vmem:[#allocation7 + $0x18] sm:$0xff] %v378_v48  }
  0xc8   :  { %v215_v49 = vpop.f32.mrf.mxu2  ;;  %v225_v50 = vpop.f32.mrf.mxu3 }
  0xc9   :  { %v216_v53 = vadd.f32 %v436_v18, %v215_v49  ;;  %v226_v54 = vadd.f32 %v436_v18, %v225_v50 }
  0xcb   :  { %v388_v55 = vpack.c.bf16 %v216_v53, %v214_v51  ;;  %v398_v56 = vpack.c.bf16 %v226_v54, %v224_v52 }
  0xcd   :  { %404 = vst [vmem:[#allocation7 + $0x28] sm:$0xff] %v388_v55  }
  0xce   :  { %406 = vst [vmem:[#allocation7 + $0x38] sm:$0xff] %v398_v56  }
  0xcf   :  { %272 = dma.vmem_to_hbm [thread:$0]  %s265_s24, 1024, %s267_s27, [#allocation4], %s516_s20, %s516_s20, %s517_s21  }
  0xd0   :  { %513 = dma.done.wait [#allocation4], 1024  }
  0xd1   :  { %514 = vsyncadd [#allocation4], 4294966272 }
  0xd2   :  { %277 = vsyncpa [#allocation3], 1 }
  0xd3   :  { %278 = vsyncpa [#allocation6], 1 }
  0xd4   :  { %279 = vsyncpa [#allocation4], 1 }

</bundles_post_ra>
